<compile_context>
chip_gen: v7x
topology: tpu7x:2x2x1
jax: 0.10.0
libtpu: 0.0.40
codegen_flags: <defaults>
</compile_context>

<pallas_src>
import functools

import jax
import jax.numpy as jnp
from jax.experimental import pallas as pl
from jax.experimental.pallas import tpu as pltpu


def _vmem_capacity_bytes():
    try:
        return int(pltpu.get_tpu_info().vmem_capacity_bytes)
    except Exception:
        return 64 << 20          # conservative default (v7x per-TC VMEM)


def _attention_from_pooled(pooled, w1, w2):
    """pooled: (C, 2) f32 = [avg | max] columns. Returns sigmoid(fc(avg)+fc(max)) as (C,1) f32."""
    h = jnp.dot(w1, pooled, preferred_element_type=jnp.float32)        # (Cr, 2)
    h = jnp.maximum(h, 0.0)                                            # ReLU (per column)
    logits = jnp.dot(w2, h, preferred_element_type=jnp.float32)        # (C, 2)
    return jax.nn.sigmoid(jnp.sum(logits, axis=-1, keepdims=True))     # (C, 1)


# ---------------------------------------------------------------------------
# Fused path: per-batch slab resident in VMEM -> one HBM read + one HBM write.
# ---------------------------------------------------------------------------
def _fused_kernel(inv_hw, x_ref, w1_ref, w2_ref, o_ref):
    # x_ref: (1, C, HW); w1_ref: (Cr, C); w2_ref: (C, Cr); o_ref: (1, C, HW) in x's dtype.
    x = x_ref[0].astype(jnp.float32)                                   # (C, HW) f32 for pooling
    avg = jnp.sum(x, axis=-1, keepdims=True) * inv_hw                  # (C, 1)
    mx = jnp.max(x, axis=-1, keepdims=True)                            # (C, 1)
    att = _attention_from_pooled(jnp.concatenate([avg, mx], axis=-1),
                                 w1_ref[...], w2_ref[...])             # (C, 1) f32
    # Multiply in the input dtype (native bf16 on v6e/v7x); att broadcast over lanes.
    o_ref[0] = x_ref[0] * att.astype(o_ref.dtype)


# ---------------------------------------------------------------------------
# Two-phase fallback (slab too big for VMEM): HW-tiled pool+FC, then scale.
# ---------------------------------------------------------------------------
def _pool_fc_kernel(inv_hw, hw, x_ref, w1_ref, w2_ref, att_ref, sum_ref, max_ref):
    # Grid (B, nt), nt = cdiv(HW, T); the tail tile is masked (sum: 0, max: -inf).
    t = pl.program_id(1)

    @pl.when(t == 0)
    def _init():
        sum_ref[...] = jnp.zeros_like(sum_ref)
        max_ref[...] = jnp.full_like(max_ref[...], -jnp.inf)

    x = x_ref[0].astype(jnp.float32)                                   # (C, T)
    tile = x.shape[-1]
    lane = jax.lax.broadcasted_iota(jnp.int32, x.shape, dimension=1)
    valid = (t * tile + lane) < hw
    sum_ref[...] += jnp.sum(jnp.where(valid, x, 0.0), axis=-1, keepdims=True)
    max_ref[...] = jnp.maximum(
        max_ref[...],
        jnp.max(jnp.where(valid, x, -jnp.inf), axis=-1, keepdims=True))

    @pl.when(t == pl.num_programs(1) - 1)
    def _finalize():
        pooled = jnp.concatenate([sum_ref[...] * inv_hw, max_ref[...]], axis=-1)   # (C, 2)
        att_ref[0] = _attention_from_pooled(pooled, w1_ref[...], w2_ref[...])


def _scale_kernel(x_ref, att_ref, o_ref):
    # x_ref: (1, C, T); att_ref: (1, C, 1) f32; o_ref: (1, C, T) in x's dtype.
    # Tail lanes of the last tile are never written back, so no masking is needed here.
    o_ref[0] = x_ref[0] * att_ref[0].astype(o_ref.dtype)


def _pick_hw_tile(hw, c, itemsize, budget_bytes):
    """Lane tile: a multiple of 128 capped by the per-block VMEM budget (tail is masked)."""
    hw_pad = int(pl.cdiv(hw, 128)) * 128
    max_lanes = max(128, (budget_bytes // (max(c, 8) * itemsize)) // 128 * 128)
    return int(min(hw_pad, max_lanes))


def channel_attention(x_nchw, w1, w2):
    """x_nchw: (B, C, H, W); w1: (Cr, C); w2: (C, Cr). Returns (B, C, H, W) in x's dtype."""
    B, C, H, W = x_nchw.shape
    Cr = w1.shape[0]
    HW = H * W

    x = x_nchw.reshape(B, C, HW)                  # free, contiguous (native NCHW order)
    w1f = jnp.asarray(w1, jnp.float32)
    w2f = jnp.asarray(w2, jnp.float32)

    itemsize = jnp.dtype(x.dtype).itemsize
    vmem_cap = _vmem_capacity_bytes()
    vmem_limit = int(min((vmem_cap * 3) // 4, 96 << 20))   # 96 MiB on v5e/v6e, 48 MiB on v7x
    w_bytes = 2 * Cr * C * 4

    # Fused-path footprint: double-buffered in + out slabs (native dtype) plus ~2 f32
    # working copies of the slab inside the kernel, plus (double-buffered) weights.
    slab_native = C * HW * itemsize
    slab_f32 = C * HW * 4
    fused_need = 4 * slab_native + 2 * slab_f32 + 2 * w_bytes
    use_fused = fused_need <= (vmem_limit * 4) // 5

    if use_fused:
        out = pl.pallas_call(
            functools.partial(_fused_kernel, 1.0 / HW),
            out_shape=jax.ShapeDtypeStruct((B, C, HW), x.dtype),
            grid_spec=pltpu.PrefetchScalarGridSpec(
                num_scalar_prefetch=0,
                grid=(B,),
                in_specs=[
                    pl.BlockSpec((1, C, HW), lambda b: (b, 0, 0)),
                    pl.BlockSpec((Cr, C), lambda b: (0, 0)),
                    pl.BlockSpec((C, Cr), lambda b: (0, 0)),
                ],
                out_specs=pl.BlockSpec((1, C, HW), lambda b: (b, 0, 0)),
            ),
            compiler_params=pltpu.CompilerParams(
                dimension_semantics=("parallel",),
                vmem_limit_bytes=vmem_limit),
        )(x, w1f, w2f)
        return out.reshape(B, C, H, W)

    # ----------------- Two-phase fallback (huge per-batch slabs) -----------------
    # Per-block budget: ~2 MiB on v7x (64 MiB VMEM), ~4 MiB on v5e/v6e (128 MiB).
    # TODO(synk): v7x dual-TC HW-split for B==1 (per-core partial pools + combine) not implemented.
    block_budget = max(1 << 20, vmem_cap // 32)
    T = _pick_hw_tile(HW, C, itemsize, block_budget)
    nt = int(pl.cdiv(HW, T))

    att = pl.pallas_call(
        functools.partial(_pool_fc_kernel, 1.0 / HW, HW),
        out_shape=jax.ShapeDtypeStruct((B, C, 1), jnp.float32),
        grid_spec=pltpu.PrefetchScalarGridSpec(
            num_scalar_prefetch=0,
            grid=(B, nt),
            in_specs=[
                pl.BlockSpec((1, C, T), lambda b, t: (b, 0, t)),
                # Constant index_map -> fetched once; single-buffer to save VMEM.
                pl.BlockSpec((Cr, C), lambda b, t: (0, 0),
                             pipeline_mode=pl.Buffered(1)),
                pl.BlockSpec((C, Cr), lambda b, t: (0, 0),
                             pipeline_mode=pl.Buffered(1)),
            ],
            out_specs=pl.BlockSpec((1, C, 1), lambda b, t: (b, 0, 0)),
            scratch_shapes=[
                pltpu.VMEM((C, 1), jnp.float32),   # running sum
                pltpu.VMEM((C, 1), jnp.float32),   # running max
            ],
        ),
        compiler_params=pltpu.CompilerParams(
            dimension_semantics=("parallel", "arbitrary"),
            vmem_limit_bytes=vmem_limit),
    )(x, w1f, w2f)

    out = pl.pallas_call(
        _scale_kernel,
        out_shape=jax.ShapeDtypeStruct((B, C, HW), x.dtype),
        grid_spec=pltpu.PrefetchScalarGridSpec(
            num_scalar_prefetch=0,
            grid=(B, nt),
            in_specs=[
                pl.BlockSpec((1, C, T), lambda b, t: (b, 0, t)),
                pl.BlockSpec((1, C, 1), lambda b, t: (b, 0, 0)),
            ],
            out_specs=pl.BlockSpec((1, C, T), lambda b, t: (b, 0, t)),
        ),
        compiler_params=pltpu.CompilerParams(
            dimension_semantics=("parallel", "parallel"),
            vmem_limit_bytes=vmem_limit),
    )(x, att)

    return out.reshape(B, C, H, W)


def _reference(x, w1, w2):
    # Pure-JAX reference mirroring the PyTorch module (NCHW).
    xf = x.astype(jnp.float32)
    avg = jnp.mean(xf, axis=(2, 3))                # (B, C)
    mx = jnp.max(xf, axis=(2, 3))                  # (B, C)

    def fc(p):
        h = jnp.maximum(p @ w1.T, 0.0)             # (B, Cr)
        return h @ w2.T                            # (B, C)

    att = jax.nn.sigmoid(fc(avg) + fc(mx))         # (B, C)
    return (xf * att[:, :, None, None]).astype(x.dtype)


if __name__ == "__main__":
    key = jax.random.PRNGKey(0)
    k_x, k_w1, k_w2 = jax.random.split(key, 3)

    B, C, H, W = 2, 32, 16, 16
    reduction = 16
    Cr = C // reduction                            # = 2

    x = jax.random.normal(k_x, (B, C, H, W), dtype=jnp.float32)
    # Deterministic "kaiming-ish" 1x1-conv weights (no bias, kernel_size=1).
    w1 = jax.random.normal(k_w1, (Cr, C), dtype=jnp.float32) * (2.0 / C) ** 0.5
    w2 = jax.random.normal(k_w2, (C, Cr), dtype=jnp.float32) * (2.0 / Cr) ** 0.5

    out = channel_attention(x, w1, w2)
    out = jax.block_until_ready(out)

    ref = _reference(x, w1, w2)
    assert out.shape == (B, C, H, W)
    assert out.dtype == x.dtype
    assert jnp.allclose(out, ref, atol=1e-5, rtol=1e-5), "mismatch vs reference"

    print("KERNEL_OK")
</pallas_src>

<mosaic_0001>
module attributes {stable_mosaic.version = 11 : i64} {
  func.func @_fused_kernel(%arg0: i32, %arg1: memref<1x32x256xf32, #tpu.memory_space<vmem>>, %arg2: memref<2x32xf32, #tpu.memory_space<vmem>>, %arg3: memref<32x2xf32, #tpu.memory_space<vmem>>, %arg4: memref<1x32x256xf32, #tpu.memory_space<vmem>>) attributes {dimension_semantics = [#tpu.dimension_semantics<parallel>], iteration_bounds = array<i64: 2>, scalar_prefetch = 0 : i64, scratch_operands = 0 : i64, tpu.core_type = #tpu.core_type<tc>, window_params = [{transform_indices = @transform_0, window_bounds = array<i64: 1, 32, 256>}, {pipeline_mode = #tpu.pipeline_mode<synchronous>, transform_indices = @transform_1, window_bounds = array<i64: 2, 32>}, {pipeline_mode = #tpu.pipeline_mode<synchronous>, transform_indices = @transform_2, window_bounds = array<i64: 32, 2>}, {transform_indices = @transform_3, window_bounds = array<i64: 1, 32, 256>}]} {
    %c0 = arith.constant 0 : index
    %c0_0 = arith.constant 0 : index
    %c0_1 = arith.constant 0 : index
    %0 = vector.load %arg1[%c0, %c0_0, %c0_1] : memref<1x32x256xf32, #tpu.memory_space<vmem>>, vector<1x32x256xf32>
    %1 = vector.shape_cast %0 : vector<1x32x256xf32> to vector<32x256xf32>
    %cst = arith.constant dense<0.000000e+00> : vector<32xf32>
    %2 = vector.multi_reduction <add>, %1, %cst [1] : vector<32x256xf32> to vector<32xf32>
    %3 = vector.shape_cast %2 : vector<32xf32> to vector<32x1xf32>
    %cst_2 = arith.constant 3.906250e-03 : f32
    %4 = vector.broadcast %cst_2 : f32 to vector<32x1xf32>
    %5 = arith.mulf %3, %4 : vector<32x1xf32>
    %cst_3 = arith.constant dense<0xFF800000> : vector<32xf32>
    %6 = vector.multi_reduction <maximumf>, %1, %cst_3 [1] : vector<32x256xf32> to vector<32xf32>
    %7 = vector.shape_cast %6 : vector<32xf32> to vector<32x1xf32>
    %8 = tpu.concatenate %5, %7 in 1 : vector<32x1xf32>, vector<32x1xf32> -> vector<32x2xf32>
    %c0_4 = arith.constant 0 : index
    %c0_5 = arith.constant 0 : index
    %9 = vector.load %arg2[%c0_4, %c0_5] : memref<2x32xf32, #tpu.memory_space<vmem>>, vector<2x32xf32>
    %c0_6 = arith.constant 0 : index
    %c0_7 = arith.constant 0 : index
    %10 = vector.load %arg3[%c0_6, %c0_7] : memref<32x2xf32, #tpu.memory_space<vmem>>, vector<32x2xf32>
    %cst_8 = arith.constant dense<0.000000e+00> : vector<2x2xf32>
    %11 = tpu.matmul %9, %8, %cst_8 {dimension_numbers = #tpu.dot_dimension_numbers<[1], [0], [0], [1], [0, 0, 1, 1], [], []>} : vector<2x32xf32>, vector<32x2xf32>, vector<2x2xf32> -> vector<2x2xf32>
    %cst_9 = arith.constant 0.000000e+00 : f32
    %12 = vector.broadcast %cst_9 : f32 to vector<2x2xf32>
    %13 = arith.maximumf %11, %12 : vector<2x2xf32>
    %cst_10 = arith.constant dense<0.000000e+00> : vector<32x2xf32>
    %14 = tpu.matmul %10, %13, %cst_10 {dimension_numbers = #tpu.dot_dimension_numbers<[1], [0], [0], [1], [0, 0, 1, 1], [], []>} : vector<32x2xf32>, vector<2x2xf32>, vector<32x2xf32> -> vector<32x2xf32>
    %cst_11 = arith.constant dense<0.000000e+00> : vector<32xf32>
    %15 = vector.multi_reduction <add>, %14, %cst_11 [1] : vector<32x2xf32> to vector<32xf32>
    %16 = vector.shape_cast %15 : vector<32xf32> to vector<32x1xf32>
    %17 = arith.negf %16 : vector<32x1xf32>
    %18 = math.exp %17 : vector<32x1xf32>
    %cst_12 = arith.constant 1.000000e+00 : f32
    %19 = vector.broadcast %cst_12 : f32 to vector<32x1xf32>
    %20 = arith.addf %19, %18 : vector<32x1xf32>
    %21 = arith.divf %19, %20 : vector<32x1xf32>
    %c0_13 = arith.constant 0 : index
    %c0_14 = arith.constant 0 : index
    %c0_15 = arith.constant 0 : index
    %22 = vector.load %arg1[%c0_13, %c0_14, %c0_15] : memref<1x32x256xf32, #tpu.memory_space<vmem>>, vector<1x32x256xf32>
    %23 = vector.shape_cast %22 : vector<1x32x256xf32> to vector<32x256xf32>
    %24 = vector.broadcast %21 : vector<32x1xf32> to vector<32x256xf32>
    %25 = arith.mulf %23, %24 : vector<32x256xf32>
    %c0_16 = arith.constant 0 : index
    %c0_17 = arith.constant 0 : index
    %c0_18 = arith.constant 0 : index
    %26 = vector.load %arg4[%c0_16, %c0_17, %c0_18] : memref<1x32x256xf32, #tpu.memory_space<vmem>>, vector<1x32x256xf32>
    %27 = vector.shape_cast %26 : vector<1x32x256xf32> to vector<32x256xf32>
    %28 = vector.shape_cast %25 : vector<32x256xf32> to vector<1x32x256xf32>
    tpu.vector_store %arg4[%c0_16, %c0_17, %c0_18], %28 {strides = array<i32>} : memref<1x32x256xf32, #tpu.memory_space<vmem>>, vector<1x32x256xf32>,
    return
  }
  func.func @transform_0(%arg0: i32) -> (i32, i32, i32) {
    %c0_i32 = arith.constant 0 : i32
    %c0_i32_0 = arith.constant 0 : i32
    %c0_i32_1 = arith.constant 0 : i32
    return %arg0, %c0_i32, %c0_i32_0 : i32, i32, i32
  }
  func.func @transform_1(%arg0: i32) -> (i32, i32) {
    %c0_i32 = arith.constant 0 : i32
    %c0_i32_0 = arith.constant 0 : i32
    %c0_i32_1 = arith.constant 0 : i32
    return %c0_i32, %c0_i32_0 : i32, i32
  }
  func.func @transform_2(%arg0: i32) -> (i32, i32) {
    %c0_i32 = arith.constant 0 : i32
    %c0_i32_0 = arith.constant 0 : i32
    %c0_i32_1 = arith.constant 0 : i32
    return %c0_i32, %c0_i32_0 : i32, i32
  }
  func.func @transform_3(%arg0: i32) -> (i32, i32, i32) {
    %c0_i32 = arith.constant 0 : i32
    %c0_i32_0 = arith.constant 0 : i32
    %c0_i32_1 = arith.constant 0 : i32
    return %arg0, %c0_i32, %c0_i32_0 : i32, i32, i32
  }
}

</mosaic_0001>

<bundles_post_ra>
// kernel: tpu_custom_call.1
= control target key start
LH: loop header
LB: loop body
LE: loop exit
PB: predicated region body
PF: predicated region fallthrough
CT: control target
= control target key end

     0   :  { %8 = vsyncpa [#allocation3], 0  ;;  %s1037_s0 = inlined_call_operand.hbm [shape: f32[2,32,256], index: 0, kind: input, shape index: {}]   ;;  %s1038_s1 = inlined_call_operand.vmem [shape: f32[2,32], index: 1, kind: input, shape index: {}]   ;;  %s1039_s2 = inlined_call_operand.vmem [shape: f32[32,2], index: 2, kind: input, shape index: {}]   ;;  %s1040_s3 = inlined_call_operand.hbm [shape: f32[2,32,256], index: 3, kind: output, shape index: {}]  }
   0x1   :  { %10 = vsyncpa [#allocation3 + $0x1], 0 }
   0x2   :  { %11 = vsyncpa [#allocation4], 0 }
   0x3   :  { %13 = vsyncpa [#allocation4 + $0x1], 0  ;;  %s808_s12 = smov 0   ;;  %s810_s13 = smov 0  }
   0x4   :  { %s812_s14 = smov 0   ;;  %s814_s15 = smov 0  }
   0x5 LB: > { %s829_s16 = sadd.s32 4294967295, %s777_s15   ;;  %s551_s17 = sadd.s32 4294967294, %s777_s15   ;;  %s777_s15 = sphi %s814_s15, %s1053_s15   ;;  %s773_s14 = sphi %s812_s14, %s1052_s14   ;;  %s769_s13 = sphi %s810_s13, %s1051_s13   ;;  %s765_s12 = sphi %s808_s12, %s1050_s12  }
   0x6   : > { %s833_s18 = sadd.s32 1, %s777_s15   ;;  %s26_s19 = sadd.s32 1, %s773_s14 }
   0x7   : > { %s23_s20 = ssub.s32 %s777_s15, %s833_s18  ;;  %p33_p0 = scmp.ne.s32.totalorder %s773_s14, %s769_s13 }
   0x8   : > { %p24_p1 = scmp.eq.s32.totalorder %s23_s20, 0  ;;  %p34_p2 = scmp.eq.s32.totalorder %s777_s15, 0 }
   0x9   : > { %p39_p3 = scmp.ne.s32.totalorder %s769_s13, %s765_s12  ;;  %p40_p4 = scmp.eq.s32.totalorder %s829_s16, 0 }
   0xa   : > { %s845_s21 = scalar_select %p24_p1, %s773_s14, %s26_s19  }
   0xb   : > { %p847_p5 = por %p34_p2, %p33_p0  ;;  %p851_p6 = por %p40_p4, %p39_p3 }
   0xc   : > { %p105_p7 = scmp.eq.s32.totalorder %s829_s16, 1  ;;  %p111_p8 = scmp.eq.s32.totalorder %s551_s17, 1 }
   0xd   : > { %p624_p10 = scmp.lt.s32.totalorder %s777_s15, 2  ;;  %s137_s26 = sand.u32 1, %s773_s14  }
   0xe   : > { %p858_p11 = por %p105_p7, %p33_p0  ;;  %p862_p12 = por %p111_p8, %p39_p3 }
   0xf   : > { %s575_s27 = sshll.u32 %s777_s15, 10  ;;  %s554_s28 = sshll.u32 %s137_s26, 6 }
  0x10   : > { %s1044_s24 = scalar_select %p858_p11, 1, 0 }
  0x11   : > { %s1045_s25 = scalar_select %p862_p12, 1, 0 }
  0x12   : > { %s871_s4 = scalar_lea.hbm %s1037_s0, %s575_s27  ;;  %s141_s5 = scalar_lea.vmem [#allocation2], %s554_s28 }
  0x13   : > { %s148_s6 = sshll.u32 %s141_s5, 4  ;;  %p875_p13 = pnand %p624_p10, %p847_p5  ;;  %s879_s6 = int_to_ptr.vmem [resolvable:$true] %s148_s6 }
  0x14   : > { %s881_s8 = scalar_lea.sflag [#allocation3], %s137_s26  ;;  %s681_s9 = scalar_lea.hbm %s871_s4, 1024 }
  0x15   : > { %p682_p0 = scmp.ne.s32.totalorder %s871_s4, %s681_s9  ;;  %p683_p1 = pneg %p875_p13 }
  0x16   : > { %s686_s17 = scalar_lea.hbm %s1037_s0, 2048  ;;  %p687_p4 = scmp.lt.u32.totalorder %s871_s4, %s1037_s0 }
  0x17   : > { %p684_p2 = pnand %p683_p1, %p682_p0  ;;  %p688_p5 = scmp.lt.u32.totalorder %s686_s17, %s681_s9 }
  0x18   : > { %p690_p8 = scmp.lt.u32.totalorder %s681_s9, %s871_s4 }
  0x19   : > { %p685_p3 = pneg %p684_p2  ;;  %p689_p7 = por %p688_p5, %p687_p4 }
  0x1b   : > { %p691_p10 = por %p690_p8, %p689_p7 }
  0x1d   : > { %p692_p9 = pnand %p691_p10, %p685_p3 }
  0x1f   : > { %695 = shalt.err (!%p692_p9)
}
  0x20   : > { %s696_s22 = scalar_lea.vmem %s879_s6, 1024  ;;  %s779_s26 = smov [#allocation2]  }
  0x21   : > { %p697_p0 = scmp.ne.s32.totalorder %s879_s6, %s696_s22  ;;  %s701_s27 = sshll.u32 %s779_s26, 4  ;;  %s702_s27 = int_to_ptr.vmem [resolvable:$false] %s701_s27 }
  0x22   : > { %s703_s28 = scalar_lea.vmem %s702_s27, 2048  ;;  %p704_p11 = scmp.lt.s32.totalorder %s879_s6, %s702_s27 }
  0x23   : > { %p699_p2 = pnand %p697_p0, %p683_p1  ;;  %p705_p4 = scmp.lt.s32.totalorder %s703_s28, %s696_s22 }
  0x25   : > { %p700_p12 = pneg %p699_p2  ;;  %p706_p5 = por %p705_p4, %p704_p11 }
  0x27   : > { %p707_p7 = pnand %p706_p5, %p700_p12 }
  0x29   : > { %710 = shalt.err (!%p707_p7)
}
  0x2a   : > { %s780_s29 = smov 256   ;;  %s781_s30 = smov 16  }
  0x2b   : > { %619 = dma.hbm_to_vmem [thread:$0]  (!%p875_p13), %s871_s4, 1024, %s879_s6, %s881_s8, %s780_s29, %s780_s29, %s781_s30  }
  0x2c   : > { %p557_p9 = scmp.ge.s32.totalorder %s777_s15, 1  ;;  %p156_p1 = scmp.lt.s32.totalorder %s777_s15, 3 }
  0x2e   : > { %p157_p3 = pnand %p557_p9, %p156_p1 }
  0x2f   : > { %s912_s5 = sand.u32 (!%p157_p3), 1, %s769_s13  }
  0x30   : > { %160 = sbr.rel (%p157_p3) target bundleno = 838 (0x346), region = 32  ;;  %s558_s9 = sshll.u32 (!%p157_p3), %s912_s5, 6 }
  0x31   : > { %s163_s10 = scalar_lea.sflag (!%p157_p3), [#allocation3], %s912_s5  ;;  %s166_s11 = scalar_lea.vmem (!%p157_p3), [#allocation2], %s558_s9 }
  0x37   : > { %756 = dma.done.wait (%p851_p6), %s163_s10, 1024  }
  0x38   : > { %758 = vsyncadd (%p851_p6), %s163_s10, 4294966272  ;;  %v922_v0 = vld [vmem:[%s166_s11] sm:$0xff]  ;;  %v924_v1 = vld [vmem:[%s166_s11 + $0x8] sm:$0xff]  ;;  %v782_v16 = vmov 0.0|0.0   ;;  %vm783_vm0 = vmmov 0   ;;  %v784_v17 = vmov 0.0  }
  0x39   : > { %v926_v2 = vld [vmem:[%s166_s11 + $0x10] sm:$0xff]  ;;  %v213_v3 = vmax.f32 %v922_v0, %v924_v1  ;;  %v197_v4 = vadd.f32 %v924_v1, %v922_v0  ;;  %v932_v5 = vld [vmem:[%s166_s11 + $0x18] sm:$0xff]  ;;  %v942_v10 = vld [vmem:[%s166_s11 + $0x20] sm:$0xff]  ;;  %606 = vmatprep.subr.bf16.mxu0 %v782_v16  ;;  %595 = vmatprep.mubr.msk.f32.mxu0 %vm783_vm0, %v784_v17  ;;  %vm225_vm1 = vcmask 7168   ;;  %vm235_vm2 = vcmask 261120   ;;  %s576_s27 = sshll.u32 %s829_s16, 10 }
  0x3a   : > { %v216_v6 = vmax.f32 %v926_v2, %v932_v5  ;;  %v200_v7 = vadd.f32 %v932_v5, %v926_v2  ;;  %v938_v8 = vld [vmem:[%s166_s11 + $0x30] sm:$0xff]  ;;  %v940_v9 = vld [vmem:[%s166_s11 + $0x38] sm:$0xff]  ;;  %v944_v11 = vld [vmem:[%s166_s11 + $0x28] sm:$0xff]  ;;  %vm310_vm3 = vcmask 15360   ;;  %vm323_vm4 = vcmask 1041408   ;;  %s188_s28 = scalar_lea.vmem [#allocation5], %s558_s9  ;;  %s989_s11 = scalar_lea.hbm %s1040_s3, %s576_s27 }
  0x3b   : > { %214 = vmax.xlane.f32.xlu1 %v213_v3  ;;  %198 = vadd.xlane.f32.xlu0 %v197_v4  ;;  %v206_v12 = vadd.f32 %v940_v9, %v938_v8  ;;  %v203_v13 = vadd.f32 %v944_v11, %v942_v10  ;;  %v222_v14 = vmax.f32 %v938_v8, %v940_v9  ;;  %v230_v36 = vld [vmem:[%s1038_s1] sm:$0x3]  ;;  %v232_v41 = vld [vmem:[%s1039_s2 + $0x8] sm:$0xff]  ;;  %v233_v42 = vld [vmem:[%s1039_s2 + $0x10] sm:$0xff]  ;;  %s478_s29 = sshll.u32 %s188_s28, 4  ;;  %s465_s16 = scalar_lea.sflag [#allocation4], %s912_s5  ;;  %s991_s29 = int_to_ptr.vmem [resolvable:$true] %s478_s29 }
  0x3c   : > { %v219_v15 = vmax.f32 %v942_v10, %v944_v11  ;;  %v231_v37 = vld [vmem:[%s1039_s2] sm:$0xff]  ;;  %v234_v43 = vld [vmem:[%s1039_s2 + $0x18] sm:$0xff]  ;;  %s711_s9 = scalar_lea.vmem %s991_s29, 1024  ;;  %p1047_p11 = scmp.ne.s32.totalorder %s1044_s24, 0 }
  0x3d   : > { %600 = vmatprep.mubr.msk.f32.mxu1 %vm310_vm3, %v231_v37  ;;  %p712_p6 = scmp.ne.s32.totalorder %s991_s29, %s711_s9  ;;  %s785_s23 = smov [#allocation5]  }
  0x3e   : > { %s715_s4 = sshll.u32 %s785_s23, 4  ;;  %s716_s4 = int_to_ptr.vmem [resolvable:$false] %s715_s4 }
  0x3f   : > { %217 = vmax.xlane.f32.xlu1 %v216_v6  ;;  %201 = vadd.xlane.f32.xlu0 %v200_v7  ;;  %p713_p12 = pnand %p712_p6, %p1047_p11  ;;  %s717_s6 = scalar_lea.vmem %s716_s4, 2048 }
  0x40   : > { %p718_p8 = scmp.lt.s32.totalorder %s991_s29, %s716_s4  ;;  %p719_p10 = scmp.lt.s32.totalorder %s717_s6, %s711_s9 }
  0x41   : > { %p714_p13 = pneg %p713_p12 }
  0x42   : > { %p720_p0 = por %p719_p10, %p718_p8 }
  0x43   : > { %207 = vadd.xlane.f32.xlu1 %v206_v12  ;;  %204 = vadd.xlane.f32.xlu0 %v203_v13 }
  0x44   : > { %p721_p2 = pnand %p720_p0, %p714_p13 }
  0x47   : > { %223 = vmax.xlane.f32.xlu1 %v222_v14  ;;  %220 = vmax.xlane.f32.xlu0 %v219_v15 }
  0xc8   : > { %v215_v18 = vpop.xlane.xlu1 %214  ;;  %v199_v19 = vpop.xlane.xlu0 %198 }
  0xc9   : > { %v209_v20 = vmul.f32 0.00390625, %v199_v19 }
  0xcb   : > { %v226_v24 = vsel %vm225_vm1, %v209_v20, %v215_v18 }
  0xcc   : > { %v218_v21 = vpop.xlane.xlu1 %217  ;;  %v202_v22 = vpop.xlane.xlu0 %201 }
  0xcd   : > { %v210_v23 = vmul.f32 0.00390625, %v202_v22 }
  0xcf   : > { %v227_v25 = vsel %vm225_vm1, %v210_v23, %v218_v21 }
  0xd0   : > { %v208_v26 = vpop.xlane.xlu1 %207  ;;  %v205_v27 = vpop.xlane.xlu0 %204  ;;  %v607_v28 = vpack.c.bf16 %v227_v25, %v226_v24 }
  0xd1   : > { %v212_v29 = vmul.f32 0.00390625, %v208_v26  ;;  %v211_v30 = vmul.f32 0.00390625, %v205_v27 }
  0xd2   : > { %608 = vmatpush3.bf16.msra.mxu0 %v607_v28 }
  0xd3   : > { %609 = vmatprep.subr.bf16.mxu0 %v782_v16 }
  0xd4   : > { %v224_v31 = vpop.xlane.xlu1 %223  ;;  %v221_v32 = vpop.xlane.xlu0 %220 }
  0xd5   : > { %v229_v33 = vsel %vm225_vm1, %v212_v29, %v224_v31  ;;  %v228_v34 = vsel %vm225_vm1, %v211_v30, %v221_v32 }
  0xd6   : > { %v610_v35 = vpack.c.bf16 %v229_v33, %v228_v34 }
  0xd8   : > { %611 = vmatpush3.bf16.msra.mxu0 %v610_v35 }
  0xdb   : > { %596 = vmatmul.mubr.msk.f32.vlgmr.msra.gmra.mrb[0].mxu0 %vm235_vm2, %v230_v36 }
 0x1ae   : > { %v305_v38 = vpop.f32.mrb[0].mxu0 }
 0x1af   : > { %v309_v39 = vmax.f32 %v305_v38, 0.0  ;;  %v597_v40 = vpop.f32.mrb[1].mxu0 }
 0x1b1   : > { %598 = vmatprep.subr.msk.mxu1 %vm323_vm4, %v309_v39 }
 0x1b2   : > { %599 = vmatpush3.msk.msra.mxu1 %vm323_vm4, %v309_v39 }
 0x1b3   : > { %601 = vmatmul.mubr.msk.f32.vlgmr.msra.gmra.mrb[0].mxu1 %vm310_vm3, %v232_v41 }
 0x1b4   : > { %603 = vmatprep.mubr.msk.f32.mxu1 %vm310_vm3, %v233_v42 }
 0x1b7   : > { %604 = vmatmul.mubr.msk.f32.gmra.mrb[2].mxu1 %vm310_vm3, %v234_v43 }
 0x286   : > { %v602_v44 = vpop.f32.mrb[0].mxu1 }
 0x287   : > { %v393_v45 = vpop.f32.mrb[1].mxu1  ;;  %v415_v46 = vsel %vm310_vm3, %v602_v44, 0.0 }
 0x288   : > { %416 = vadd.xlane.f32.xlu1 %v415_v46  ;;  %v412_v47 = vsel %vm310_vm3, %v393_v45, 0.0 }
 0x289   : > { %413 = vadd.xlane.f32.xlu0 %v412_v47 }
 0x28a   : > { %v605_v48 = vpop.f32.mrb[2].mxu1 }
 0x28b   : > { %v403_v49 = vpop.f32.mrb[3].mxu1  ;;  %v421_v50 = vsel %vm310_vm3, %v605_v48, 0.0 }
 0x28c   : > { %422 = vadd.xlane.f32.xlu1 %v421_v50  ;;  %v418_v51 = vsel %vm310_vm3, %v403_v49, 0.0 }
 0x28d   : > { %419 = vadd.xlane.f32.xlu0 %v418_v51 }
 0x315   : > { %v417_v52 = vpop.xlane.xlu1 %416 }
 0x316   : > { %v567_v53 = vmul.f32 -1.442695, %v417_v52  ;;  %v414_v54 = vpop.xlane.xlu0 %413 }
 0x317   : > { %v566_v55 = vmul.f32 -1.442695, %v414_v54 }
 0x318   : > { %665 = vpow2.f32 %v567_v53 }
 0x319   : > { %667 = vpow2.f32 %v566_v55  ;;  %v423_v56 = vpop.xlane.xlu1 %422 }
 0x31a   : > { %v569_v57 = vmul.f32 -1.442695, %v423_v56  ;;  %v420_v58 = vpop.xlane.xlu0 %419 }
 0x31b   : > { %v568_v59 = vmul.f32 -1.442695, %v420_v58 }
 0x31c   : > { %669 = vpow2.f32 %v569_v57 }
 0x31d   : > { %671 = vpow2.f32 %v568_v59 }
 0x322   : > { %v666_v60 = vpop.eup %665 }
 0x323   : > { %v668_v61 = vpop.eup %667  ;;  %v437_v62 = vadd.f32 1.0, %v666_v60 }
 0x324   : > { %v436_v63 = vadd.f32 1.0, %v668_v61 }
 0x325   : > { %673 = vrcp.f32 %v437_v62 }
 0x326   : > { %v670_v3 = vpop.eup %669  ;;  %675 = vrcp.f32 %v436_v63 }
 0x327   : > { %v672_v4 = vpop.eup %671  ;;  %v439_v6 = vadd.f32 1.0, %v670_v3 }
 0x328   : > { %v438_v7 = vadd.f32 1.0, %v672_v4 }
 0x329   : > { %677 = vrcp.f32 %v439_v6 }
 0x32a   : > { %679 = vrcp.f32 %v438_v7 }
 0x32f   : > { %v674_v12 = vpop.eup %673 }
 0x330   : > { %v676_v13 = vpop.eup %675  ;;  %v450_v14 = vmul.f32 %v674_v12, %v926_v2  ;;  %v451_v15 = vmul.f32 %v674_v12, %v932_v5 }
 0x331   : > { %v448_v16 = vmul.f32 %v676_v13, %v922_v0  ;;  %v449_v17 = vmul.f32 %v676_v13, %v924_v1 }
 0x332   : > { %458 = vst [vmem:[%s188_s28 + $0x10] sm:$0xff] %v450_v14  ;;  %459 = vst [vmem:[%s188_s28 + $0x18] sm:$0xff] %v451_v15 }
 0x333   : > { %v678_v18 = vpop.eup %677  ;;  %456 = vst [vmem:[%s188_s28] sm:$0xff] %v448_v16  ;;  %457 = vst [vmem:[%s188_s28 + $0x8] sm:$0xff] %v449_v17 }
 0x334   : > { %v680_v19 = vpop.eup %679  ;;  %v454_v2 = vmul.f32 %v678_v18, %v938_v8  ;;  %v455_v5 = vmul.f32 %v678_v18, %v940_v9 }
 0x335   : > { %v452_v0 = vmul.f32 %v680_v19, %v942_v10  ;;  %v453_v1 = vmul.f32 %v680_v19, %v944_v11 }
 0x336   : > { %462 = vst [vmem:[%s188_s28 + $0x30] sm:$0xff] %v454_v2  ;;  %463 = vst [vmem:[%s188_s28 + $0x38] sm:$0xff] %v455_v5 }
 0x337   : > { %460 = vst [vmem:[%s188_s28 + $0x20] sm:$0xff] %v452_v0  ;;  %461 = vst [vmem:[%s188_s28 + $0x28] sm:$0xff] %v453_v1 }
 0x338   : > { %724 = shalt.err (!%p721_p2)
}
 0x339   : > { %s725_s7 = scalar_lea.hbm %s989_s11, 1024  ;;  %s729_s19 = scalar_lea.hbm %s1040_s3, 2048 }
 0x33a   : > { %p726_p4 = scmp.ne.s32.totalorder %s989_s11, %s725_s7  ;;  %p730_p9 = scmp.lt.u32.totalorder %s989_s11, %s1040_s3 }
 0x33b   : > { %p731_p1 = scmp.lt.u32.totalorder %s729_s19, %s725_s7  ;;  %p733_p6 = scmp.lt.u32.totalorder %s725_s7, %s989_s11 }
 0x33c   : > { %p727_p5 = pnand %p726_p4, %p1047_p11 }
 0x33d   : > { %p732_p3 = por %p731_p1, %p730_p9 }
 0x33e   : > { %p728_p7 = pneg %p727_p5 }
 0x33f   : > { %p734_p12 = por %p733_p6, %p732_p3 }
 0x341   : > { %p735_p13 = pnand %p734_p12, %p728_p7 }
 0x343   : > { %738 = shalt.err (!%p735_p13)
}
 0x344   : > { %s786_s26 = smov 256   ;;  %s787_s27 = smov 16  }
 0x345   : > { %614 = dma.vmem_to_hbm [thread:$0]  (%p1047_p11), %s991_s29, 1024, %s989_s11, %s465_s16, %s786_s26, %s786_s26, %s787_s27  }
 0x346 PF: > { %s493_s28 = sand.u32 1, %s765_s12   ;;  %p1048_p8 = scmp.ne.s32.totalorder %s1045_s25, 0 }
 0x347   : > { %p1049_p10 = scmp.ge.s32.totalorder %s777_s15, 2  ;;  %s494_s30 = scalar_lea.sflag [#allocation4], %s493_s28 }
 0x349   : > { %p621_p0 = pnand %p1049_p10, %p1048_p8 }
 0x34b   : > { %760 = dma.done.wait (!%p621_p0), %s494_s30, 1024  }
 0x34c   : > { %762 = vsyncadd (!%p621_p0), %s494_s30, 4294966272  ;;  %p16_p2 = scmp.ge.s32.totalorder %s833_s18, 4   ;;  %s1050_s12 = smov %s769_s13 }
 0x34d   : > { %s1051_s13 = smov %s773_s14  ;;  %s1052_s14 = smov %s845_s21 }
 0x34e   : > { %s1053_s15 = smov %s833_s18  ;;  %18 = sbr.rel (!%p16_p2) target bundleno = 5 (0x5), region = 77 }
 0x355   :  { %499 = vsyncpa [#allocation3], 1 }
 0x356   :  { %501 = vsyncpa [#allocation3 + $0x1], 1 }
 0x357   :  { %502 = vsyncpa [#allocation4], 1 }
 0x358   :  { %504 = vsyncpa [#allocation4 + $0x1], 1 }

</bundles_post_ra>
